<compile_context>
chip_gen: v7x
topology: tpu7x:2x2x1
jax: 0.10.0
libtpu: 0.0.40
codegen_flags: <defaults>
</compile_context>

<pallas_src>
import functools

import jax
import jax.numpy as jnp
from jax.experimental import pallas as pl
from jax.experimental.pallas import tpu as pltpu

NEG_SLOPE = 0.2  # PyG GATConv default negative_slope


def _gat_skip_kernel(x_src_ref, x_dst_ref, adj_ref, wsrc_ref, wdst_ref,
                     bias_ref, o_ref, *, heads, d_pad):
    x_src = x_src_ref[...]        # [N, in_dim]   all (source) nodes, resident
    x_dst = x_dst_ref[...]        # [TM, in_dim]  this tile's destination nodes

    # Fused MXU calls:
    #   big_src = [ h_head0 (d_pad) | h_head1 (d_pad) | ... | a_src (heads) ]
    #   big_dst = [ residual projection (d_pad)       | a_dst (heads) ]
    big_src = jnp.dot(x_src, wsrc_ref[...],
                      preferred_element_type=jnp.float32)  # [N, heads*d_pad+heads]
    big_dst = jnp.dot(x_dst, wdst_ref[...],
                      preferred_element_type=jnp.float32)  # [TM, d_pad+heads]

    # One transpose for all heads (hoisted out of the head loop): [heads, N].
    a_src_t = jnp.transpose(big_src[:, heads * d_pad:heads * d_pad + heads])
    res = big_dst[:, :d_pad]                               # [TM, d_pad]
    a_dst = big_dst[:, d_pad:d_pad + heads]                # [TM, heads]

    # Adjacency mask computed once, reused by every head.
    mask = adj_ref[...] > 0                                # bf16 -> bool [TM, N]
    neg_inf = jnp.float32(-1e30)

    tm = x_dst.shape[0]
    acc = jnp.zeros((tm, d_pad), jnp.float32)
    for hd in range(heads):       # heads is tiny & static -> unrolled
        h = big_src[:, hd * d_pad:(hd + 1) * d_pad]        # 128-lane aligned slice
        # e[i, j] = LeakyReLU(a_dst[i] + a_src[j])   (i = dst row, j = src col)
        e = a_dst[:, hd:hd + 1] + a_src_t[hd:hd + 1, :]    # [TM, N]
        e = jnp.where(e > 0, e, NEG_SLOPE * e)             # LeakyReLU
        e = jnp.where(mask, e, neg_inf)                    # masked softmax
        m = jnp.max(e, axis=1, keepdims=True)
        p = jnp.exp(e - m)        # masked entries underflow to 0 exactly
                                  # (self-loops guarantee a finite row max)
        denom = jnp.maximum(jnp.sum(p, axis=1, keepdims=True), 1e-20)
        alpha = p * pl.reciprocal(denom, approx=True)      # EUP vrcp (off-VPU)
        acc = acc + jnp.dot(alpha, h, preferred_element_type=jnp.float32)

    # concat=False -> average heads; bias_ref already holds gat_bias + res_bias.
    o_ref[...] = (acc * (1.0 / heads) + bias_ref[...] + res).astype(o_ref.dtype)


def gat_layer_with_skip(x, adj, w, att_src, att_dst, bias, w_res, b_res,
                        *, heads, out_dim, tile_m=None):
    n, in_dim = x.shape
    tm = n if tile_m is None else tile_m
    assert n % tm == 0 and (tm % 8 == 0 or tm == n), "bad destination tile size"
    n_tiles = n // tm

    # Pad per-head feature blocks / residual / output to 128 lanes so head
    # slices are vreg-aligned and the output store is lane-dense.
    d_pad = ((out_dim + 127) // 128) * 128

    w_h = w.reshape(in_dim, heads, out_dim)                       # per-head W
    w_pad = jnp.zeros((in_dim, heads, d_pad), jnp.float32)
    w_pad = w_pad.at[:, :, :out_dim].set(w_h).reshape(in_dim, heads * d_pad)

    # Attention-projection columns folded into the node-feature matmul:
    #   a_src[n, h] = x[n] @ (W_h @ att_src[h]);  same for a_dst.
    a_src_cols = jnp.einsum("kho,ho->kh", w_h, att_src)           # [in_dim, heads]
    a_dst_cols = jnp.einsum("kho,ho->kh", w_h, att_dst)           # [in_dim, heads]

    w_src_big = jnp.concatenate([w_pad, a_src_cols], axis=1)      # [in, heads*d_pad+heads]
    w_res_pad = jnp.zeros((in_dim, d_pad), jnp.float32).at[:, :out_dim].set(w_res)
    w_dst_big = jnp.concatenate([w_res_pad, a_dst_cols], axis=1)  # [in, d_pad+heads]

    bias_pad = jnp.zeros((1, d_pad), jnp.float32).at[:, :out_dim].set(bias + b_res)

    adj_bf16 = adj.astype(jnp.bfloat16)  # only compared against 0 -> half the DMA

    kernel = functools.partial(_gat_skip_kernel, heads=heads, d_pad=d_pad)
    out_pad = pl.pallas_call(
        kernel,
        out_shape=jax.ShapeDtypeStruct((n, d_pad), jnp.float32),
        grid=(n_tiles,),
        in_specs=[
            pl.BlockSpec((n, in_dim), lambda i: (0, 0)),     # x: all source nodes (resident)
            pl.BlockSpec((tm, in_dim), lambda i: (i, 0)),    # x: this tile's dst nodes
            pl.BlockSpec((tm, n), lambda i: (i, 0)),         # adjacency rows of the dst tile
            pl.BlockSpec(w_src_big.shape, lambda i: (0, 0)),
            pl.BlockSpec(w_dst_big.shape, lambda i: (0, 0)),
            pl.BlockSpec((1, d_pad), lambda i: (0, 0)),
        ],
        out_specs=pl.BlockSpec((tm, d_pad), lambda i: (i, 0)),
        compiler_params=pltpu.CompilerParams(
            dimension_semantics=("parallel",),               # megacore on v7x
            vmem_limit_bytes=64 * 1024 * 1024),
    )(x, x, adj_bf16, w_src_big, w_dst_big, bias_pad)

    return out_pad[:, :out_dim]


def build_adjacency(edge_index, num_nodes):
    """Dense mask adj[dst, src] = 1 for each edge src->dst, plus self-loops."""
    src, dst = edge_index[0], edge_index[1]
    adj = jnp.zeros((num_nodes, num_nodes), jnp.float32)
    adj = adj.at[dst, src].set(1.0)
    adj = adj + jnp.eye(num_nodes, dtype=jnp.float32)   # add_self_loops=True
    return jnp.minimum(adj, 1.0)


def _reference(x, adj, w, att_src, att_dst, bias, w_res, b_res, *, heads, out_dim):
    """Plain-JAX reference matching the PyTorch module's forward."""
    n, in_dim = x.shape
    h = (x @ w).reshape(n, heads, out_dim)
    a_src = jnp.einsum("nho,ho->nh", h, att_src)
    a_dst = jnp.einsum("nho,ho->nh", h, att_dst)
    acc = jnp.zeros((n, out_dim), jnp.float32)
    for hd in range(heads):
        e = a_dst[:, hd][:, None] + a_src[:, hd][None, :]
        e = jnp.where(e > 0, e, NEG_SLOPE * e)
        e = jnp.where(adj > 0, e, -1e30)
        alpha = jax.nn.softmax(e, axis=1)
        acc = acc + alpha @ h[:, hd, :]
    gat = acc / heads + bias
    return gat + x @ w_res + b_res


if __name__ == "__main__":
    N = 32          # number of nodes
    IN_DIM = 8
    OUT_DIM = 16
    HEADS = 2       # concat=False -> heads are averaged
    TILE_M = 16     # 2 destination tiles -> exercises tiling + parallel grid axis

    key = jax.random.PRNGKey(0)
    k_x, k_w, k_as, k_ad, k_b, k_wr, k_br = jax.random.split(key, 7)

    # Node features.
    x = jax.random.normal(k_x, (N, IN_DIM), jnp.float32)

    # Deterministic ring graph, both directions: edge_index[0]=src, [1]=dst.
    src = jnp.concatenate([jnp.arange(N), (jnp.arange(N) + 1) % N])
    dst = jnp.concatenate([(jnp.arange(N) + 1) % N, jnp.arange(N)])
    edge_index = jnp.stack([src, dst]).astype(jnp.int32)
    adj = build_adjacency(edge_index, N)

    # GATConv parameters (deterministic init; shapes per PyG GATConv).
    w = 0.1 * jax.random.normal(k_w, (IN_DIM, HEADS * OUT_DIM), jnp.float32)
    att_src = 0.1 * jax.random.normal(k_as, (HEADS, OUT_DIM), jnp.float32)
    att_dst = 0.1 * jax.random.normal(k_ad, (HEADS, OUT_DIM), jnp.float32)
    bias = 0.1 * jax.random.normal(k_b, (1, OUT_DIM), jnp.float32)

    # Residual projection nn.Linear(in_dim, out_dim) since in_dim != out_dim.
    w_res = 0.1 * jax.random.normal(k_wr, (IN_DIM, OUT_DIM), jnp.float32)
    b_res = 0.1 * jax.random.normal(k_br, (1, OUT_DIM), jnp.float32)

    out = gat_layer_with_skip(x, adj, w, att_src, att_dst, bias, w_res, b_res,
                              heads=HEADS, out_dim=OUT_DIM, tile_m=TILE_M)
    out = jax.block_until_ready(out)

    ref = _reference(x, adj, w, att_src, att_dst, bias, w_res, b_res,
                     heads=HEADS, out_dim=OUT_DIM)

    assert out.shape == (N, OUT_DIM)
    assert bool(jnp.all(jnp.isfinite(out)))
    max_err = float(jnp.max(jnp.abs(out - ref)))
    assert max_err < 1e-2, f"mismatch vs reference: {max_err}"
    print("KERNEL_OK")
</pallas_src>

<mosaic_0001>
module attributes {stable_mosaic.version = 11 : i64} {
  func.func @_gat_skip_kernel(%arg0: i32, %arg1: memref<32x8xf32, #tpu.memory_space<vmem>>, %arg2: memref<16x8xf32, #tpu.memory_space<vmem>>, %arg3: memref<16x32xbf16, #tpu.memory_space<vmem>>, %arg4: memref<8x258xf32, #tpu.memory_space<vmem>>, %arg5: memref<8x130xf32, #tpu.memory_space<vmem>>, %arg6: memref<1x128xf32, #tpu.memory_space<vmem>>, %arg7: memref<16x128xf32, #tpu.memory_space<vmem>>) attributes {dimension_semantics = [#tpu.dimension_semantics<parallel>], iteration_bounds = array<i64: 2>, scalar_prefetch = 0 : i64, scratch_operands = 0 : i64, tpu.core_type = #tpu.core_type<tc>, window_params = [{pipeline_mode = #tpu.pipeline_mode<synchronous>, transform_indices = @transform_0, window_bounds = array<i64: 32, 8>}, {transform_indices = @transform_1, window_bounds = array<i64: 16, 8>}, {transform_indices = @transform_2, window_bounds = array<i64: 16, 32>}, {pipeline_mode = #tpu.pipeline_mode<synchronous>, transform_indices = @transform_3, window_bounds = array<i64: 8, 258>}, {pipeline_mode = #tpu.pipeline_mode<synchronous>, transform_indices = @transform_4, window_bounds = array<i64: 8, 130>}, {pipeline_mode = #tpu.pipeline_mode<synchronous>, transform_indices = @transform_5, window_bounds = array<i64: 1, 128>}, {transform_indices = @transform_6, window_bounds = array<i64: 16, 128>}]} {
    %c0 = arith.constant 0 : index
    %c0_0 = arith.constant 0 : index
    %0 = vector.load %arg1[%c0, %c0_0] : memref<32x8xf32, #tpu.memory_space<vmem>>, vector<32x8xf32>
    %c0_1 = arith.constant 0 : index
    %c0_2 = arith.constant 0 : index
    %1 = vector.load %arg2[%c0_1, %c0_2] : memref<16x8xf32, #tpu.memory_space<vmem>>, vector<16x8xf32>
    %c0_3 = arith.constant 0 : index
    %c0_4 = arith.constant 0 : index
    %2 = vector.load %arg4[%c0_3, %c0_4] : memref<8x258xf32, #tpu.memory_space<vmem>>, vector<8x258xf32>
    %cst = arith.constant dense<0.000000e+00> : vector<32x258xf32>
    %3 = tpu.matmul %0, %2, %cst {dimension_numbers = #tpu.dot_dimension_numbers<[1], [0], [0], [1], [0, 0, 1, 1], [], []>} : vector<32x8xf32>, vector<8x258xf32>, vector<32x258xf32> -> vector<32x258xf32>
    %c0_5 = arith.constant 0 : index
    %c0_6 = arith.constant 0 : index
    %4 = vector.load %arg5[%c0_5, %c0_6] : memref<8x130xf32, #tpu.memory_space<vmem>>, vector<8x130xf32>
    %cst_7 = arith.constant dense<0.000000e+00> : vector<16x130xf32>
    %5 = tpu.matmul %1, %4, %cst_7 {dimension_numbers = #tpu.dot_dimension_numbers<[1], [0], [0], [1], [0, 0, 1, 1], [], []>} : vector<16x8xf32>, vector<8x130xf32>, vector<16x130xf32> -> vector<16x130xf32>
    %6 = vector.extract_strided_slice %3 {offsets = [0, 256], sizes = [32, 2], strides = [1, 1]} : vector<32x258xf32> to vector<32x2xf32>
    %7 = tpu.transpose %6, [1, 0] : vector<32x2xf32> -> vector<2x32xf32>
    %8 = vector.extract_strided_slice %5 {offsets = [0, 0], sizes = [16, 128], strides = [1, 1]} : vector<16x130xf32> to vector<16x128xf32>
    %9 = vector.extract_strided_slice %5 {offsets = [0, 128], sizes = [16, 2], strides = [1, 1]} : vector<16x130xf32> to vector<16x2xf32>
    %c0_8 = arith.constant 0 : index
    %c0_9 = arith.constant 0 : index
    %10 = vector.load %arg3[%c0_8, %c0_9] : memref<16x32xbf16, #tpu.memory_space<vmem>>, vector<16x32xbf16>
    %cst_10 = arith.constant 0.000000e+00 : bf16
    %11 = vector.broadcast %cst_10 : bf16 to vector<16x32xbf16>
    %12 = arith.cmpf ogt, %10, %11 : vector<16x32xbf16>
    %cst_11 = arith.constant 0.000000e+00 : f32
    %13 = vector.broadcast %cst_11 : f32 to vector<16x128xf32>
    %14 = vector.extract_strided_slice %3 {offsets = [0, 0], sizes = [32, 128], strides = [1, 1]} : vector<32x258xf32> to vector<32x128xf32>
    %15 = vector.extract_strided_slice %9 {offsets = [0, 0], sizes = [16, 1], strides = [1, 1]} : vector<16x2xf32> to vector<16x1xf32>
    %16 = vector.extract_strided_slice %7 {offsets = [0, 0], sizes = [1, 32], strides = [1, 1]} : vector<2x32xf32> to vector<1x32xf32>
    %17 = vector.broadcast %15 : vector<16x1xf32> to vector<16x32xf32>
    %18 = vector.broadcast %16 : vector<1x32xf32> to vector<16x32xf32>
    %19 = arith.addf %17, %18 : vector<16x32xf32>
    %cst_12 = arith.constant 0.000000e+00 : f32
    %20 = vector.broadcast %cst_12 : f32 to vector<16x32xf32>
    %21 = arith.cmpf ogt, %19, %20 : vector<16x32xf32>
    %cst_13 = arith.constant 2.000000e-01 : f32
    %22 = vector.broadcast %cst_13 : f32 to vector<16x32xf32>
    %23 = arith.mulf %22, %19 : vector<16x32xf32>
    %24 = arith.select %21, %19, %23 : vector<16x32xi1>, vector<16x32xf32>
    %cst_14 = arith.constant -1.000000e+30 : f32
    %25 = vector.broadcast %cst_14 : f32 to vector<16x32xf32>
    %26 = arith.select %12, %24, %25 : vector<16x32xi1>, vector<16x32xf32>
    %cst_15 = arith.constant dense<0xFF800000> : vector<16xf32>
    %27 = vector.multi_reduction <maximumf>, %26, %cst_15 [1] : vector<16x32xf32> to vector<16xf32>
    %28 = vector.shape_cast %27 : vector<16xf32> to vector<16x1xf32>
    %29 = vector.broadcast %28 : vector<16x1xf32> to vector<16x32xf32>
    %30 = arith.subf %26, %29 : vector<16x32xf32>
    %31 = math.exp %30 : vector<16x32xf32>
    %cst_16 = arith.constant dense<0.000000e+00> : vector<16xf32>
    %32 = vector.multi_reduction <add>, %31, %cst_16 [1] : vector<16x32xf32> to vector<16xf32>
    %33 = vector.shape_cast %32 : vector<16xf32> to vector<16x1xf32>
    %cst_17 = arith.constant 9.99999968E-21 : f32
    %34 = vector.broadcast %cst_17 : f32 to vector<16x1xf32>
    %35 = arith.maximumf %33, %34 : vector<16x1xf32>
    %36 = tpu.reciprocal %35 {approx = true} : vector<16x1xf32> -> vector<16x1xf32>
    %37 = vector.broadcast %36 : vector<16x1xf32> to vector<16x32xf32>
    %38 = arith.mulf %31, %37 : vector<16x32xf32>
    %cst_18 = arith.constant dense<0.000000e+00> : vector<16x128xf32>
    %39 = tpu.matmul %38, %14, %cst_18 {dimension_numbers = #tpu.dot_dimension_numbers<[1], [0], [0], [1], [0, 0, 1, 1], [], []>} : vector<16x32xf32>, vector<32x128xf32>, vector<16x128xf32> -> vector<16x128xf32>
    %40 = arith.addf %13, %39 : vector<16x128xf32>
    %41 = vector.extract_strided_slice %3 {offsets = [0, 128], sizes = [32, 128], strides = [1, 1]} : vector<32x258xf32> to vector<32x128xf32>
    %42 = vector.extract_strided_slice %9 {offsets = [0, 1], sizes = [16, 1], strides = [1, 1]} : vector<16x2xf32> to vector<16x1xf32>
    %43 = vector.extract_strided_slice %7 {offsets = [1, 0], sizes = [1, 32], strides = [1, 1]} : vector<2x32xf32> to vector<1x32xf32>
    %44 = vector.broadcast %42 : vector<16x1xf32> to vector<16x32xf32>
    %45 = vector.broadcast %43 : vector<1x32xf32> to vector<16x32xf32>
    %46 = arith.addf %44, %45 : vector<16x32xf32>
    %cst_19 = arith.constant 0.000000e+00 : f32
    %47 = vector.broadcast %cst_19 : f32 to vector<16x32xf32>
    %48 = arith.cmpf ogt, %46, %47 : vector<16x32xf32>
    %cst_20 = arith.constant 2.000000e-01 : f32
    %49 = vector.broadcast %cst_20 : f32 to vector<16x32xf32>
    %50 = arith.mulf %49, %46 : vector<16x32xf32>
    %51 = arith.select %48, %46, %50 : vector<16x32xi1>, vector<16x32xf32>
    %cst_21 = arith.constant -1.000000e+30 : f32
    %52 = vector.broadcast %cst_21 : f32 to vector<16x32xf32>
    %53 = arith.select %12, %51, %52 : vector<16x32xi1>, vector<16x32xf32>
    %cst_22 = arith.constant dense<0xFF800000> : vector<16xf32>
    %54 = vector.multi_reduction <maximumf>, %53, %cst_22 [1] : vector<16x32xf32> to vector<16xf32>
    %55 = vector.shape_cast %54 : vector<16xf32> to vector<16x1xf32>
    %56 = vector.broadcast %55 : vector<16x1xf32> to vector<16x32xf32>
    %57 = arith.subf %53, %56 : vector<16x32xf32>
    %58 = math.exp %57 : vector<16x32xf32>
    %cst_23 = arith.constant dense<0.000000e+00> : vector<16xf32>
    %59 = vector.multi_reduction <add>, %58, %cst_23 [1] : vector<16x32xf32> to vector<16xf32>
    %60 = vector.shape_cast %59 : vector<16xf32> to vector<16x1xf32>
    %cst_24 = arith.constant 9.99999968E-21 : f32
    %61 = vector.broadcast %cst_24 : f32 to vector<16x1xf32>
    %62 = arith.maximumf %60, %61 : vector<16x1xf32>
    %63 = tpu.reciprocal %62 {approx = true} : vector<16x1xf32> -> vector<16x1xf32>
    %64 = vector.broadcast %63 : vector<16x1xf32> to vector<16x32xf32>
    %65 = arith.mulf %58, %64 : vector<16x32xf32>
    %cst_25 = arith.constant dense<0.000000e+00> : vector<16x128xf32>
    %66 = tpu.matmul %65, %41, %cst_25 {dimension_numbers = #tpu.dot_dimension_numbers<[1], [0], [0], [1], [0, 0, 1, 1], [], []>} : vector<16x32xf32>, vector<32x128xf32>, vector<16x128xf32> -> vector<16x128xf32>
    %67 = arith.addf %40, %66 : vector<16x128xf32>
    %cst_26 = arith.constant 5.000000e-01 : f32
    %68 = vector.broadcast %cst_26 : f32 to vector<16x128xf32>
    %69 = arith.mulf %67, %68 : vector<16x128xf32>
    %c0_27 = arith.constant 0 : index
    %c0_28 = arith.constant 0 : index
    %70 = vector.load %arg6[%c0_27, %c0_28] : memref<1x128xf32, #tpu.memory_space<vmem>>, vector<1x128xf32>
    %71 = vector.broadcast %70 : vector<1x128xf32> to vector<16x128xf32>
    %72 = arith.addf %69, %71 : vector<16x128xf32>
    %73 = arith.addf %72, %8 : vector<16x128xf32>
    %c0_29 = arith.constant 0 : index
    %c0_30 = arith.constant 0 : index
    %74 = vector.load %arg7[%c0_29, %c0_30] : memref<16x128xf32, #tpu.memory_space<vmem>>, vector<16x128xf32>
    tpu.vector_store %arg7[%c0_29, %c0_30], %73 {strides = array<i32>} : memref<16x128xf32, #tpu.memory_space<vmem>>, vector<16x128xf32>,
    return
  }
  func.func @transform_0(%arg0: i32) -> (i32, i32) {
    %c0_i32 = arith.constant 0 : i32
    %c0_i32_0 = arith.constant 0 : i32
    %c0_i32_1 = arith.constant 0 : i32
    return %c0_i32, %c0_i32_0 : i32, i32
  }
  func.func @transform_1(%arg0: i32) -> (i32, i32) {
    %c0_i32 = arith.constant 0 : i32
    %c0_i32_0 = arith.constant 0 : i32
    return %arg0, %c0_i32 : i32, i32
  }
  func.func @transform_2(%arg0: i32) -> (i32, i32) {
    %c0_i32 = arith.constant 0 : i32
    %c0_i32_0 = arith.constant 0 : i32
    return %arg0, %c0_i32 : i32, i32
  }
  func.func @transform_3(%arg0: i32) -> (i32, i32) {
    %c0_i32 = arith.constant 0 : i32
    %c0_i32_0 = arith.constant 0 : i32
    %c0_i32_1 = arith.constant 0 : i32
    return %c0_i32, %c0_i32_0 : i32, i32
  }
  func.func @transform_4(%arg0: i32) -> (i32, i32) {
    %c0_i32 = arith.constant 0 : i32
    %c0_i32_0 = arith.constant 0 : i32
    %c0_i32_1 = arith.constant 0 : i32
    return %c0_i32, %c0_i32_0 : i32, i32
  }
  func.func @transform_5(%arg0: i32) -> (i32, i32) {
    %c0_i32 = arith.constant 0 : i32
    %c0_i32_0 = arith.constant 0 : i32
    %c0_i32_1 = arith.constant 0 : i32
    return %c0_i32, %c0_i32_0 : i32, i32
  }
  func.func @transform_6(%arg0: i32) -> (i32, i32) {
    %c0_i32 = arith.constant 0 : i32
    %c0_i32_0 = arith.constant 0 : i32
    return %arg0, %c0_i32 : i32, i32
  }
}

</mosaic_0001>

<bundles_post_ra>
// kernel: tpu_custom_call.1
= control target key start
LH: loop header
LB: loop body
LE: loop exit
PB: predicated region body
PF: predicated region fallthrough
CT: control target
= control target key end

     0   :  { %s1998_s0 = inlined_call_operand.hbm [shape: f32[32,8], index: 0, kind: input, shape index: {}]   ;;  %s1999_s1 = inlined_call_operand.hbm [shape: f32[32,8], index: 1, kind: input, shape index: {}]   ;;  %s2000_s2 = inlined_call_operand.hbm [shape: bf16[32,32], index: 2, kind: input, shape index: {}]   ;;  %s2001_s3 = inlined_call_operand.hbm [shape: f32[8,258], index: 3, kind: input, shape index: {}]   ;;  %s2002_s4 = inlined_call_operand.hbm [shape: f32[8,130], index: 4, kind: input, shape index: {}]   ;;  %s2003_s5 = inlined_call_operand.hbm [shape: f32[1,128], index: 5, kind: input, shape index: {}]   ;;  %s2004_s6 = inlined_call_operand.hbm [shape: f32[32,128], index: 6, kind: output, shape index: {}]  }
   0x1   :  { %2019 = sst [smem:[#allocation24_spill]] %s1999_s1 }
   0x2   :  { %2020 = sst [smem:[#allocation25_spill]] %s2001_s3 }
   0x3   :  { %11 = vsyncpa [#allocation3], 0 }
   0x4   :  { %12 = vsyncpa [#allocation6], 0 }
   0x5   :  { %14 = vsyncpa [#allocation6 + $0x1], 0 }
   0x6   :  { %15 = vsyncpa [#allocation9], 0 }
   0x7   :  { %16 = vsyncpa [#allocation12], 0 }
   0x8   :  { %17 = vsyncpa [#allocation4], 0 }
   0x9   :  { %19 = vsyncpa [#allocation4 + $0x1], 0  ;;  %s1642_s21 = smov 0   ;;  %s1644_s22 = smov 0  }
   0xa   :  { %s1646_s23 = smov 0   ;;  %s1648_s24 = smov 0  }
   0xb LB: > { %2021 = sst [smem:[#allocation19_spill]] %s1577_s21  ;;  %s1663_s25 = sadd.s32 4294967295, %s1589_s24   ;;  %s1589_s24 = sphi %s1648_s24, %s2057_s24   ;;  %s1585_s23 = sphi %s1646_s23, %s2059_s23   ;;  %s1581_s22 = sphi %s1644_s22, %s2061_s22   ;;  %s1577_s21 = sphi %s1642_s21, %s2060_s21  }
   0xc   : > { %2022 = sst [smem:[#allocation20_spill]] %s1585_s23  ;;  %s1109_s26 = sadd.s32 4294967294, %s1589_s24  }
   0xd   : > { %p66_p0 = scmp.ne.s32.totalorder %s1581_s22, %s1577_s21  ;;  %p2005_p1 = scmp.eq.s32.totalorder %s1663_s25, 0 }
   0xe   : > { %p185_p3 = scmp.eq.s32.totalorder %s1109_s26, 1  ;;  %p1110_p5 = scmp.ge.s32.totalorder %s1589_s24, 1 }
   0xf   : > { %p1672_p4 = por %p2005_p1, %p66_p0  ;;  %p192_p7 = scmp.lt.s32.totalorder %s1589_s24, 3 }
  0x10   : > { %p1677_p6 = por %p185_p3, %p66_p0  ;;  %s1591_s30 = smov [#allocation8]  }
  0x11   : > { %s2023_s27 = scalar_select %p1672_p4, 1, 0 }
  0x12   : > { %s2024_s28 = scalar_select %p1677_p6, 1, 0 }
  0x13   : > { %p1682_p8 = pnand %p1110_p5, %p192_p7  ;;  %s218_s7 = sshll.u32 %s1591_s30, 4  ;;  %s219_s7 = int_to_ptr.vmem [resolvable:$true] %s218_s7 }
  0x14   : > { %2025 = sst [smem:[#allocation21_spill]] %s2024_s28  ;;  %s1690_s8 = sadd.s32 1, %s1589_s24  }
  0x15   : > { %s2026_s29 = scalar_select %p1682_p8, 1, 0 }
  0x16   : > { %p1240_p10 = pneg %p1682_p8  ;;  %2027 = sst [smem:[#allocation22_spill]] %s1690_s8 }
  0x17   : > { %s50_s10 = ssub.s32 %s1589_s24, %s1690_s8  ;;  %s53_s12 = sadd.s32 1, %s1585_s23 }
  0x18   : > { %p1694_p11 = pnand %p1240_p10, %p2005_p1  ;;  %p1700_p12 = scmp.eq.s32.totalorder %s50_s10, 0 }
  0x19   : > { %s2030_s3 = sld [smem:[#allocation25_spill]] }
  0x1a   : > { %s2028_s9 = scalar_select %p1694_p11, 1, 0 }
  0x1b   : > { %s2029_s11 = scalar_select %p1700_p12, 1, 0 }
  0x1c   : > { %p1715_p3 = pneg %p1694_p11 }
  0x1f   : > { %s1339_s15 = scalar_lea.hbm %s2030_s3, 384 }
  0x20   : > { %p1340_p0 = scmp.ne.s32.totalorder %s2030_s3, %s1339_s15  ;;  %p1346_p10 = scmp.lt.u32.totalorder %s1339_s15, %s2030_s3 }
  0x22   : > { %p1342_p5 = pnand %p1715_p3, %p1340_p0 }
  0x24   : > { %p1343_p7 = pneg %p1342_p5 }
  0x26   : > { %p1348_p9 = pnand %p1346_p10, %p1343_p7 }
  0x28   : > { %1351 = shalt.err (!%p1348_p9)
}
  0x29   : > { %s1352_s26 = scalar_lea.vmem %s219_s7, 384  ;;  %p1360_p6 = scmp.lt.s32.totalorder %s219_s7, %s219_s7 }
  0x2a   : > { %p1353_p1 = scmp.ne.s32.totalorder %s219_s7, %s1352_s26  ;;  %p1361_p4 = scmp.lt.s32.totalorder %s1352_s26, %s1352_s26 }
  0x2c   : > { %p1355_p2 = pnand %p1353_p1, %p1715_p3  ;;  %p1362_p8 = por %p1361_p4, %p1360_p6 }
  0x2e   : > { %p1356_p13 = pneg %p1355_p2 }
  0x30   : > { %p1363_p12 = pnand %p1362_p8, %p1356_p13 }
  0x32   : > { %1366 = shalt.err (!%p1363_p12)
}
  0x33   : > { %1246 = dma.hbm_to_vmem [thread:$0]  (!%p1694_p11), %s2030_s3, 384, %s219_s7, [#allocation9]  }
  0x34   : > { %p2032_p1 = scmp.ne.s32.totalorder %s2029_s11, 0  ;;  %p61_p2 = scmp.eq.s32.totalorder %s1589_s24, 0 }
  0x35   : > { %p2034_p4 = scmp.ne.s32.totalorder %s1585_s23, %s1581_s22  ;;  %p2035_p6 = scmp.eq.s32.totalorder %s1663_s25, 1 }
  0x36   : > { %s1734_s13 = scalar_select %p2032_p1, %s1585_s23, %s53_s12  }
  0x37   : > { %p1742_p8 = por %p2035_p6, %p2034_p4  ;;  %p2037_p9 = pmov %p2034_p4 }
  0x38   : > { %2033 = sst [smem:[#allocation23_spill]] %s1734_s13  ;;  %p1268_p13 = scmp.lt.s32.totalorder %s1589_s24, 2 }
  0x39   : > { %s2036_s14 = scalar_select %p1742_p8, 1, 0 }
  0x3a   : > { %p62_p12 = por %p61_p2, %p2037_p9  ;;  %s251_s15 = sand.u32 1, %s1589_s24  }
  0x3b   : > { %s253_s16 = sand.u32 1, %s1585_s23   ;;  %s1150_s19 = sshll.u32 %s1589_s24, 8 }
  0x3c   : > { %s1116_s17 = sshll.u32 %s253_s16, 4  ;;  %s2038_s1 = sld [smem:[#allocation24_spill]] }
  0x3d   : > { %s255_s11 = scalar_lea.vmem [#allocation5], %s1116_s17  ;;  %p1760_p0 = pnand %p1268_p13, %p62_p12 }
  0x3e   : > { %s262_s12 = sshll.u32 %s255_s11, 4  ;;  %s1764_s10 = sshll.u32 %s253_s16, 3  ;;  %s1758_s12 = int_to_ptr.vmem [resolvable:$true] %s262_s12 }
  0x3f   : > { %s2039_s30 = scalar_select %p1760_p0, 1, 0 }
  0x40   : > { %s1766_s3 = scalar_lea.sflag [#allocation6], %s251_s15  ;;  %p2016_p7 = pneg %p1760_p0 }
  0x42   : > { %s1756_s7 = scalar_lea.hbm %s2038_s1, %s1150_s19  ;;  %s1372_s26 = scalar_lea.hbm %s2038_s1, 512 }
  0x43   : > { %s1367_s19 = scalar_lea.hbm %s1756_s7, 256  ;;  %p1373_p2 = scmp.lt.u32.totalorder %s1756_s7, %s2038_s1 }
  0x44   : > { %p1368_p5 = scmp.ne.s32.totalorder %s1756_s7, %s1367_s19  ;;  %p1374_p4 = scmp.lt.u32.totalorder %s1372_s26, %s1367_s19 }
  0x45   : > { %p1376_p9 = scmp.lt.u32.totalorder %s1367_s19, %s1756_s7 }
  0x46   : > { %p1370_p10 = pnand %p2016_p7, %p1368_p5  ;;  %p1375_p6 = por %p1374_p4, %p1373_p2 }
  0x48   : > { %p1371_p1 = pneg %p1370_p10  ;;  %p1377_p12 = por %p1376_p9, %p1375_p6 }
  0x4a   : > { %p1378_p13 = pnand %p1377_p12, %p1371_p1 }
  0x4c   : > { %1381 = shalt.err (!%p1378_p13)
}
  0x4d   : > { %s1382_s15 = scalar_lea.vmem %s1758_s12, 256  ;;  %s1592_s16 = smov [#allocation5]  }
  0x4e   : > { %p1383_p5 = scmp.ne.s32.totalorder %s1758_s12, %s1382_s15  ;;  %s1387_s17 = sshll.u32 %s1592_s16, 4  ;;  %s1388_s17 = int_to_ptr.vmem [resolvable:$false] %s1387_s17 }
  0x4f   : > { %s1389_s13 = scalar_lea.vmem %s1388_s17, 512  ;;  %p1390_p11 = scmp.lt.s32.totalorder %s1758_s12, %s1388_s17 }
  0x50   : > { %p1385_p10 = pnand %p1383_p5, %p2016_p7  ;;  %p1391_p2 = scmp.lt.s32.totalorder %s1389_s13, %s1382_s15 }
  0x52   : > { %p1386_p8 = pneg %p1385_p10  ;;  %p1392_p4 = por %p1391_p2, %p1390_p11 }
  0x54   : > { %p1393_p6 = pnand %p1392_p4, %p1386_p8 }
  0x56   : > { %1396 = shalt.err (!%p1393_p6)
}
  0x57   : > { %s1593_s19 = smov 128   ;;  %s1594_s20 = smov 8  }
  0x58   : > { %1256 = dma.hbm_to_vmem [thread:$0]  (!%p1760_p0), %s1756_s7, 256, %s1758_s12, %s1766_s3, %s1593_s19, %s1593_s19, %s1594_s20  }
  0x59   : > { %s276_s26 = scalar_lea.vmem [#allocation7], %s1764_s10  ;;  %s1595_s16 = smov [#allocation2]  }
  0x5a   : > { %s1795_s11 = sshll.u32 %s276_s26, 4  ;;  %s204_s1 = sshll.u32 %s1595_s16, 4  ;;  %s205_s1 = int_to_ptr.vmem [resolvable:$true] %s204_s1  ;;  %s1858_s11 = int_to_ptr.vmem [resolvable:$true] %s1795_s11 }
  0x5b   : > { %s1397_s13 = scalar_lea.hbm %s1998_s0, 512 }
  0x5c   : > { %p1398_p11 = scmp.ne.s32.totalorder %s1998_s0, %s1397_s13  ;;  %p1404_p9 = scmp.lt.u32.totalorder %s1397_s13, %s1998_s0 }
  0x5e   : > { %p1400_p8 = pnand %p1398_p11, %p1715_p3 }
  0x60   : > { %p1401_p1 = pneg %p1400_p8 }
  0x62   : > { %p1406_p12 = pnand %p1404_p9, %p1401_p1 }
  0x64   : > { %1409 = shalt.err (!%p1406_p12)
}
  0x65   : > { %s1410_s7 = scalar_lea.vmem %s205_s1, 512  ;;  %p1418_p2 = scmp.lt.s32.totalorder %s205_s1, %s205_s1 }
  0x66   : > { %p1411_p13 = scmp.ne.s32.totalorder %s205_s1, %s1410_s7  ;;  %p1419_p4 = scmp.lt.s32.totalorder %s1410_s7, %s1410_s7 }
  0x68   : > { %p1413_p5 = pnand %p1411_p13, %p1715_p3  ;;  %p1420_p6 = por %p1419_p4, %p1418_p2 }
  0x6a   : > { %p1414_p10 = pneg %p1413_p5 }
  0x6c   : > { %p1421_p7 = pnand %p1420_p6, %p1414_p10 }
  0x6e   : > { %1424 = shalt.err (!%p1421_p7)
}
  0x6f   : > { %p2040_p11 = scmp.ne.s32.totalorder %s2028_s9, 0  ;;  %s1596_s21 = smov [#allocation10]  }
  0x70   : > { %s229_s28 = sshll.u32 %s1596_s21, 4  ;;  %s1597_s12 = smov [#allocation11]   ;;  %s230_s28 = int_to_ptr.vmem [resolvable:$true] %s229_s28 }
  0x71   : > { %1243 = dma.hbm_to_vmem [thread:$0]  (!%p2040_p11), %s1998_s0, 512, %s205_s1, [#allocation3], %s1593_s19, %s1593_s19, %s1594_s20  }
  0x72   : > { %s240_s10 = sshll.u32 %s1597_s12, 4  ;;  %s1425_s15 = scalar_lea.hbm %s2002_s4, 256  ;;  %s241_s10 = int_to_ptr.vmem [resolvable:$true] %s240_s10 }
  0x73   : > { %p1426_p7 = scmp.ne.s32.totalorder %s2002_s4, %s1425_s15  ;;  %p1432_p9 = scmp.lt.u32.totalorder %s1425_s15, %s2002_s4 }
  0x75   : > { %p1428_p8 = pnand %p1426_p7, %p1715_p3 }
  0x77   : > { %p1429_p1 = pneg %p1428_p8 }
  0x79   : > { %p1434_p12 = pnand %p1432_p9, %p1429_p1 }
  0x7b   : > { %1437 = shalt.err (!%p1434_p12)
}
  0x7c   : > { %s1438_s1 = scalar_lea.vmem %s230_s28, 256  ;;  %p1446_p2 = scmp.lt.s32.totalorder %s230_s28, %s230_s28 }
  0x7d   : > { %p1439_p13 = scmp.ne.s32.totalorder %s230_s28, %s1438_s1  ;;  %p1447_p4 = scmp.lt.s32.totalorder %s1438_s1, %s1438_s1 }
  0x7f   : > { %p1441_p5 = pnand %p1439_p13, %p1715_p3  ;;  %p1448_p6 = por %p1447_p4, %p1446_p2 }
  0x81   : > { %p1442_p10 = pneg %p1441_p5 }
  0x83   : > { %p1449_p0 = pnand %p1448_p6, %p1442_p10 }
  0x85   : > { %1452 = shalt.err (!%p1449_p0)
}
  0x86   : > { %1249 = dma.hbm_to_vmem [thread:$0]  (!%p2040_p11), %s2002_s4, 256, %s230_s28, [#allocation9]  }
  0x87   : > { %s1151_s8 = sshll.u32 %s1589_s24, 7  ;;  %s1453_s26 = scalar_lea.hbm %s2003_s5, 16 }
  0x88   : > { %p1454_p7 = scmp.ne.s32.totalorder %s2003_s5, %s1453_s26  ;;  %p1460_p1 = scmp.lt.u32.totalorder %s1453_s26, %s2003_s5 }
  0x8a   : > { %p1456_p0 = pnand %p1454_p7, %p1715_p3 }
  0x8c   : > { %p1457_p8 = pneg %p1456_p0 }
  0x8e   : > { %p1462_p9 = pnand %p1460_p1, %p1457_p8 }
  0x90   : > { %1465 = shalt.err (!%p1462_p9)
}
  0x91   : > { %s1466_s28 = scalar_lea.vmem %s241_s10, 16  ;;  %s1473_s7 = scalar_lea.vmem %s241_s10, 32 }
  0x92   : > { %p1467_p12 = scmp.ne.s32.totalorder %s241_s10, %s1466_s28  ;;  %p1474_p10 = scmp.lt.s32.totalorder %s241_s10, %s241_s10 }
  0x93   : > { %p1475_p2 = scmp.lt.s32.totalorder %s1473_s7, %s1466_s28 }
  0x94   : > { %p1469_p13 = pnand %p1467_p12, %p1715_p3 }
  0x95   : > { %p1476_p4 = por %p1475_p2, %p1474_p10 }
  0x96   : > { %p1470_p5 = pneg %p1469_p13 }
  0x98   : > { %p1477_p6 = pnand %p1476_p4, %p1470_p5 }
  0x9a   : > { %1480 = shalt.err (!%p1477_p6)
}
  0x9b   : > { %1252 = dma.hbm_to_vmem [thread:$0]  (!%p2040_p11), %s2003_s5, 16, %s241_s10, [#allocation12]  }
  0x9c   : > { %s1855_s18 = scalar_lea.hbm %s2000_s2, %s1151_s8  ;;  %p2041_p7 = scmp.ne.s32.totalorder %s2039_s30, 0 }
  0x9d   : > { %s1481_s21 = scalar_lea.hbm %s1855_s18, 128  ;;  %s1486_s10 = scalar_lea.hbm %s2000_s2, 256 }
  0x9e   : > { %p1482_p3 = scmp.ne.s32.totalorder %s1855_s18, %s1481_s21  ;;  %p2042_p0 = pneg %p2041_p7 }
  0x9f   : > { %p1487_p11 = scmp.lt.u32.totalorder %s1855_s18, %s2000_s2  ;;  %p1488_p9 = scmp.lt.u32.totalorder %s1486_s10, %s1481_s21 }
  0xa0   : > { %p1484_p8 = pnand %p1482_p3, %p2042_p0  ;;  %p1490_p13 = scmp.lt.u32.totalorder %s1481_s21, %s1855_s18 }
  0xa1   : > { %p1489_p12 = por %p1488_p9, %p1487_p11 }
  0xa2   : > { %p1485_p1 = pneg %p1484_p8 }
  0xa3   : > { %p1491_p5 = por %p1490_p13, %p1489_p12 }
  0xa5   : > { %p1492_p10 = pnand %p1491_p5, %p1485_p1 }
  0xa7   : > { %1495 = shalt.err (!%p1492_p10)
}
  0xa8   : > { %s1496_s8 = scalar_lea.vmem %s1858_s11, 128  ;;  %p2043_p4 = pmov %p2042_p0 }
  0xa9   : > { %p1497_p2 = scmp.ne.s32.totalorder %s1858_s11, %s1496_s8  ;;  %s1598_s15 = smov [#allocation7]  }
  0xaa   : > { %s1501_s17 = sshll.u32 %s1598_s15, 4  ;;  %s1502_s17 = int_to_ptr.vmem [resolvable:$false] %s1501_s17 }
  0xab   : > { %p1499_p6 = pnand %p1497_p2, %p2043_p4  ;;  %s1503_s13 = scalar_lea.vmem %s1502_s17, 256 }
  0xac   : > { %p1504_p0 = scmp.lt.s32.totalorder %s1858_s11, %s1502_s17  ;;  %p1505_p8 = scmp.lt.s32.totalorder %s1503_s13, %s1496_s8 }
  0xad   : > { %p1500_p3 = pneg %p1499_p6 }
  0xae   : > { %p1506_p11 = por %p1505_p8, %p1504_p0 }
  0xb0   : > { %p1507_p9 = pnand %p1506_p11, %p1500_p3 }
  0xb2   : > { %1510 = shalt.err (!%p1507_p9)
}
  0xb3   : > { %s1599_s28 = smov 64   ;;  %s1600_s7 = smov 4  }
  0xb4   : > { %1259 = dma.hbm_to_vmem [thread:$0]  (!%p2041_p7), %s1855_s18, 128, %s1858_s11, %s1766_s3, %s1599_s28, %s1599_s28, %s1600_s7  }
  0xb5   : > { %p2044_p1 = scmp.ne.s32.totalorder %s2026_s29, 0 }
  0xb6   : > { %p2045_p12 = scmp.eq.s32.totalorder (!%p2044_p1), %s1663_s25, 0 }
  0xb7   : > { %295 = sbr.rel (%p2044_p1) target bundleno = 1177 (0x499), region = 44 }
  0xbe   : > { %1556 = dma.done.wait (%p2045_p12), [#allocation3], 512   ;;  %p2046_p13 = pmov %p2045_p12 }
  0xbf   : > { %s301_s23 = sand.u32 1, %s1663_s25   ;;  %s1892_s1 = sand.u32 1, %s1581_s22  }
  0xc0   : > { %1558 = vsyncadd (%p2046_p13), [#allocation3], 4294966784  ;;  %s1124_s19 = sshll.u32 %s1892_s1, 4  ;;  %s302_s30 = scalar_lea.sflag [#allocation6], %s301_s23 }
  0xc1   : > { %s1897_s3 = scalar_lea.vmem [#allocation5], %s1124_s19  ;;  %p2047_p7 = scmp.ne.s32.totalorder %s2023_s27, 0 }
  0xc3   : > { %1560 = dma.done.wait (%p2047_p7), %s302_s30, 384  }
  0xc4   : > { %1562 = vsyncadd (%p2047_p7), %s302_s30, 4294966912  ;;  %s1125_s29 = sshll.u32 %s1892_s1, 3  ;;  %p2048_p5 = pmov %p2045_p12 }
  0xc5   : > { %s1904_s11 = scalar_lea.vmem [#allocation7], %s1125_s29 }
  0xc6   : > { %1564 = dma.done.wait (%p2048_p5), [#allocation9], 640   ;;  %p2049_p10 = pmov %p2048_p5 }
  0xc7   : > { %p2050_p2 = pmov %p2048_p5 }
  0xc8   : > { %1566 = vsyncadd (%p2049_p10), [#allocation9], 4294966656 }
  0xc9   : > { %1568 = dma.done.wait (%p2050_p2), [#allocation12], 16   ;;  %p2051_p4 = pmov %p2050_p2 }
  0xca   : > { %v1601_v0 = vmov 0.0   ;;  %vm375_vm0 = vcmask 64512   ;;  %v374_v1 = vld [vmem:[#allocation8 + $0x10] sm:$0xff]  ;;  %v367_v3 = vld [vmem:[#allocation2 + $0x8] sm:$0xff]  ;;  %v563_v4 = vld [vmem:[#allocation10 + $0x8] sm:$0xff]  ;;  %v1602_v10 = vmov 0   ;;  %v693_v22 = vlaneseq }
  0xcb   : > { %1570 = vsyncadd (%p2051_p4), [#allocation12], 4294967280  ;;  %452 = vmatprep.mubr.f32.mxu0 %v1601_v0  ;;  %v366_v2 = vld [vmem:[#allocation2] sm:$0xff]  ;;  %1170 = vmatprep.subr.mxu1 %v374_v1  ;;  %v562_v5 = vld [vmem:[#allocation10] sm:$0xff]  ;;  %v1603_v19 = vmov 1   ;;  %vm713_vm6 = vcmask 261120  }
  0xcc   : > { %1172 = vmatprep.mubr.msk.f32.mxu1 %vm375_vm0, %v366_v2  ;;  %v368_v6 = vld [vmem:[#allocation2 + $0x10] sm:$0xff]  ;;  %1171 = vmatpush3.msra.mxu1 %v374_v1  ;;  %v369_v7 = vld [vmem:[#allocation2 + $0x18] sm:$0xff]  ;;  %v679_v24 = vld [vmem:[%s1904_s11] sm:$0xf]  ;;  %v694_v25 = vshrl.u32 %v693_v22, 7  ;;  %s359_s27 = scalar_lea.vmem [#allocation13], %s1124_s19 }
  0xcd   : > { %1173 = vmatmul.mubr.msk.f32.vlgmr.msra.gmra.mrb[0].mxu1 %vm375_vm0, %v367_v3  ;;  %570 = vmatprep.subr.mxu1 %v563_v4  ;;  %v370_v8 = vld [vmem:[%s1897_s3] sm:$0xff]  ;;  %v371_v9 = vld [vmem:[%s1897_s3 + $0x8] sm:$0xff]  ;;  %vm681_vm1 = vcmp.gt.bf16.partialorder %v679_v24, 0  ;;  %s975_s20 = sshll.u32 %s359_s27, 4  ;;  %s1152_s18 = sshll.u32 %s1663_s25, 8  ;;  %s1947_s20 = int_to_ptr.vmem [resolvable:$true] %s975_s20 }
  0xce   : > { %571 = vmatpush1.msra.mxu1 %v562_v5  ;;  %1175 = vmatprep.mubr.msk.f32.mxu1 %vm375_vm0, %v368_v6  ;;  %v373_v20 = vld [vmem:[#allocation8 + $0x8] sm:$0xff]  ;;  %v372_v21 = vld [vmem:[#allocation8] sm:$0xff]  ;;  %v695_v28 = vsub.s32 0, %v694_v25  ;;  %v748_v29 = vsub.s32 1, %v694_v25  ;;  %v705_v30 = vsel %vm681_vm1, 65537, %v1602_v10  ;;  %s1954_s12 = scalar_lea.hbm %s2004_s6, %s1152_s18  ;;  %s962_s10 = scalar_lea.sflag [#allocation4], %s1892_s1 }
  0xcf   : > { %1319 = vset.pattern.permute.xlu0 %v1602_v10  ;;  %1321 = vset.pattern.permute.xlu1 %v1602_v10  ;;  %v680_v31 = vld [vmem:[%s1904_s11 + $0x4] sm:$0xf]  ;;  %v707_v33 = vunpack.c.l.b16 %v705_v30  ;;  %s1511_s26 = scalar_lea.vmem %s1947_s20, 256  ;;  %p2052_p3 = scmp.ne.s32.totalorder %s2036_s14, 0 }
  0xd0   : > { %388 = vmatprep.subr.mxu0 %v373_v20  ;;  %vm682_vm2 = vcmp.gt.bf16.partialorder %v680_v31, 0  ;;  %p1512_p6 = scmp.ne.s32.totalorder %s1947_s20, %s1511_s26  ;;  %s1604_s25 = smov [#allocation13]  }
  0xd1   : > { %1176 = vmatmul.mubr.msk.f32.gmra.mrb[2].mxu1 %vm375_vm0, %v369_v7  ;;  %389 = vmatpush1.msra.mxu0 %v372_v21  ;;  %v706_v40 = vsel %vm682_vm2, 65537, %v1602_v10  ;;  %vm709_vm3 = vcmp.ne.s32.totalorder %v707_v33, 0  ;;  %s1515_s16 = sshll.u32 %s1604_s25, 4  ;;  %s1516_s16 = int_to_ptr.vmem [resolvable:$false] %s1515_s16 }
  0xd2   : > { %634 = vmatprep.mubr.f32.mxu1 %v1601_v0  ;;  %1130 = vmatmul.mubr.msk.f32.vlgmr.msra.gmra.mrb[0].mxu0 %vm375_vm0, %v366_v2  ;;  %v708_v43 = vunpack.c.l.b16 %v706_v40  ;;  %p1513_p0 = pnand %p1512_p6, %p2052_p3  ;;  %s1517_s8 = scalar_lea.vmem %s1516_s16, 512 }
  0xd3   : > { %458 = vmatprep.mubr.f32.mxu0 %v1601_v0  ;;  %p1518_p11 = scmp.lt.s32.totalorder %s1947_s20, %s1516_s16  ;;  %p1519_p9 = scmp.lt.s32.totalorder %s1517_s8, %s1511_s26 }
  0xd4   : > { %vm710_vm8 = vcmp.ne.s32.totalorder %v708_v43, 0  ;;  %p1514_p8 = pneg %p1513_p0 }
  0xd5   : > { %1138 = vmatmul.mubr.msk.f32.vlgmr.msra.gmra.mrb[4].mxu1 %vm375_vm0, %v370_v8  ;;  %p1520_p1 = por %p1519_p9, %p1518_p11 }
  0xd6   : > { %640 = vmatprep.mubr.f32.mxu1 %v1601_v0  ;;  %1131 = vmatmul.mubr.msk.f32.gmra.mrb[2].mxu0 %vm375_vm0, %v367_v3 }
  0xd7   : > { %464 = vmatprep.mubr.f32.mxu0 %v1601_v0  ;;  %p1521_p12 = pnand %p1520_p1, %p1514_p8 }
  0xd9   : > { %1139 = vmatmul.mubr.msk.f32.gmra.mrb[6].mxu1 %vm375_vm0, %v371_v9 }
  0xda   : > { %1132 = vmatmul.mubr.msk.f32.gmra.mrb[4].mxu0 %vm375_vm0, %v368_v6 }
  0xdb   : > { %470 = vmatprep.mubr.f32.mxu0 %v1601_v0 }
  0xde   : > { %1133 = vmatmul.mubr.msk.f32.gmra.mrb[6].mxu0 %vm375_vm0, %v369_v7 }
 0x1a0   : > { %v1174_v11 = vpop.f32.mrb[0].mxu1 }
 0x1a1   : > { %v543_v12 = vpop.f32.mrb[1].mxu1 }
 0x1a4   : > { %v1177_v13 = vpop.f32.mrb[2].mxu1 }
 0x1a5   : > { %v553_v14 = vpop.f32.mrb[3].mxu1 }
 0x1a8   : > { %v1922_v15 = vpop.f32.mrb[4].mxu1 }
 0x1a9   : > { %v638_v16 = vpop.f32.mrb[5].mxu1 }
 0x1aa   : > { %685 = vperm.xlu0 %1319, %v638_v16  }
 0x1ac   : > { %v1924_v17 = vpop.f32.mrb[6].mxu1 }
 0x1ad   : > { %v644_v18 = vpop.f32.mrb[7].mxu1 }
 0x1ae   : > { %1320 = vset.pattern.permute.xlu0 %v1603_v19  ;;  %690 = vperm.xlu1 %1321, %v644_v18  }
 0x1af   : > { %739 = vperm.xlu0 %1320, %v638_v16   ;;  %v454_v16 = vpop.f32.mrb[0].mxu0 }
 0x1b2   : > { %1322 = vset.pattern.permute.xlu1 %v1603_v19 }
 0x1b3   : > { %743 = vperm.xlu1 %1322, %v644_v18   ;;  %v456_v18 = vpop.f32.mrb[1].mxu0 }
 0x1b4   : > { %v460_v19 = vpop.f32.mrb[2].mxu0 }
 0x1b5   : > { %v1208_v20 = vpack.c.bf16 %v460_v19, %v454_v16  ;;  %v462_v21 = vpop.f32.mrb[3].mxu0 }
 0x1b6   : > { %v1200_v22 = vpack.c.bf16 %v462_v21, %v456_v18 }
 0x1b7   : > { %1209 = vmatprep.subr.bf16.mxu0 %v1208_v20 }
 0x1b8   : > { %1211 = vmatpush3.bf16.msra.mxu0 %v1208_v20  ;;  %1201 = vmatprep.subr.bf16.mxu1 %v1200_v22 }
 0x1b9   : > { %1203 = vmatpush3.bf16.msra.mxu1 %v1200_v22 }
 0x1dc   : > { %647 = vxpose.xlu1.b32.start [1/4] (short) (narrow) %v543_v12, 8 }
 0x1e0   : > { %648 = vxpose.xlu1.b32.cont [2/4] (short) (narrow) %v1174_v11, 8 }
 0x1e4   : > { %649 = vxpose.xlu1.b32.cont [3/4] (short) (narrow) %v553_v14, 8 }
 0x1e8   : > { %650 = vxpose.xlu1.b32.end [4/4] (short) (narrow) %v1177_v13, 8 }
 0x229   : > { %v686_v26 = vpop.permute.xlu0 %685 }
 0x22d   : > { %v691_v23 = vpop.permute.xlu1 %690 }
 0x22e   : > { %v740_v36 = vpop.permute.xlu0 %739 }
 0x232   : > { %v744_v27 = vpop.permute.xlu1 %743 }
 0x25c   : > { %v663_v32 = vpop.trf.xlu1 }
 0x25d   : > { %v696_v34 = vrot.slane %v663_v32, %v695_v28  ;;  %v749_v35 = vrot.slane %v663_v32, %v748_v29 }
 0x25f   : > { %v697_v37 = vadd.f32 %v696_v34, %v686_v26  ;;  %v698_v38 = vadd.f32 %v696_v34, %v691_v23  ;;  %v750_v39 = vadd.f32 %v749_v35, %v740_v36  ;;  %v751_v44 = vadd.f32 %v749_v35, %v744_v27  ;;  %v466_v23 = vpop.f32.mrb[4].mxu0 }
 0x260   : > { %v468_v24 = vpop.f32.mrb[5].mxu0 }
 0x261   : > { %vm699_vm4 = vcmp.gt.f32.partialorder %v697_v37, 0.0  ;;  %v701_v41 = vmul.f32 0.2, %v697_v37  ;;  %vm752_vm5 = vcmp.gt.f32.partialorder %v750_v39, 0.0  ;;  %v754_v42 = vmul.f32 0.2, %v750_v39 }
 0x262   : > { %v702_v47 = vmul.f32 0.2, %v698_v38  ;;  %vm700_vm7 = vcmp.gt.f32.partialorder %v698_v38, 0.0  ;;  %v755_v52 = vmul.f32 0.2, %v751_v44  ;;  %vm753_vm9 = vcmp.gt.f32.partialorder %v751_v44, 0.0 }
 0x263   : > { %v703_v45 = vsel %vm699_vm4, %v697_v37, %v701_v41  ;;  %v756_v46 = vsel %vm752_vm5, %v750_v39, %v754_v42  ;;  %v472_v25 = vpop.f32.mrb[6].mxu0 }
 0x264   : > { %v711_v48 = vsel %vm709_vm3, %v703_v45, -1e+30  ;;  %v758_v50 = vsel %vm709_vm3, %v756_v46, -1e+30  ;;  %v704_v51 = vsel %vm700_vm7, %v698_v38, %v702_v47  ;;  %v757_v55 = vsel %vm753_vm9, %v751_v44, %v755_v52  ;;  %v474_v26 = vpop.f32.mrb[7].mxu0 }
 0x265   : > { %v714_v49 = vsel %vm713_vm6, %v711_v48, -inf  ;;  %v760_v53 = vsel %vm713_vm6, %v758_v50, -inf  ;;  %v712_v54 = vsel %vm710_vm8, %v704_v51, -1e+30  ;;  %v759_v57 = vsel %vm710_vm8, %v757_v55, -1e+30 }
 0x266   : > { %715 = vmax.xlane.f32.xlu0 %v714_v49  ;;  %v717_v56 = vsel %vm713_vm6, %v712_v54, -inf  ;;  %v763_v58 = vsel %vm713_vm6, %v759_v57, -inf  ;;  %v1212_v27 = vpack.c.bf16 %v472_v25, %v466_v23  ;;  %v1204_v28 = vpack.c.bf16 %v474_v26, %v468_v24 }
 0x268   : > { %1205 = vmatprep.subr.bf16.mxu1 %v1204_v28  ;;  %1213 = vmatprep.subr.bf16.mxu0 %v1212_v27 }
 0x269   : > { %1207 = vmatpush3.bf16.msra.mxu1 %v1204_v28  ;;  %1215 = vmatpush3.bf16.msra.mxu0 %v1212_v27 }
 0x26a   : > { %761 = vmax.xlane.f32.xlu0 %v760_v53 }
 0x26e   : > { %718 = vmax.xlane.f32.xlu0 %v717_v56 }
 0x272   : > { %764 = vmax.xlane.f32.xlu0 %v763_v58 }
 0x2f3   : > { %v716_v59 = vpop.xlane.xlu0 %715 }
 0x2f4   : > { %v720_v60 = vsub.f32 %v711_v48, %v716_v59 }
 0x2f6   : > { %v722_v61 = vmul.f32 1.442695, %v720_v60 }
 0x2f7   : > { %v762_v62 = vpop.xlane.xlu0 %761 }
 0x2f8   : > { %1323 = vpow2.f32 %v722_v61  ;;  %v766_v63 = vsub.f32 %v758_v50, %v762_v62  ;;  %v1144_v50 = vld [vmem:[#allocation11] ss:$0 sm:$0xff] }
 0x2fa   : > { %v768_v0 = vmul.f32 1.442695, %v766_v63 }
 0x2fb   : > { %v719_v1 = vpop.xlane.xlu0 %718 }
 0x2fc   : > { %1325 = vpow2.f32 %v768_v0  ;;  %v721_v2 = vsub.f32 %v712_v54, %v719_v1 }
 0x2fe   : > { %v724_v3 = vmul.f32 1.442695, %v721_v2 }
 0x2ff   : > { %v765_v4 = vpop.xlane.xlu0 %764 }
 0x300   : > { %1327 = vpow2.f32 %v724_v3  ;;  %v767_v5 = vsub.f32 %v759_v57, %v765_v4 }
 0x302   : > { %v1324_v6 = vpop.eup %1323  ;;  %v770_v7 = vmul.f32 1.442695, %v767_v5 }
 0x303   : > { %v726_v8 = vsel %vm713_vm6, %v1324_v6, 0.0 }
 0x304   : > { %1329 = vpow2.f32 %v770_v7  ;;  %727 = vadd.xlane.f32.xlu0 %v726_v8 }
 0x306   : > { %v1326_v9 = vpop.eup %1325 }
 0x307   : > { %v772_v10 = vsel %vm713_vm6, %v1326_v9, 0.0 }
 0x308   : > { %773 = vadd.xlane.f32.xlu0 %v772_v10 }
 0x30a   : > { %v1328_v11 = vpop.eup %1327 }
 0x30b   : > { %v729_v12 = vsel %vm713_vm6, %v1328_v11, 0.0 }
 0x30c   : > { %730 = vadd.xlane.f32.xlu1 %v729_v12 }
 0x30e   : > { %v1330_v13 = vpop.eup %1329 }
 0x30f   : > { %v775_v14 = vsel %vm713_vm6, %v1330_v13, 0.0 }
 0x310   : > { %776 = vadd.xlane.f32.xlu0 %v775_v14 }
 0x391   : > { %v728_v29 = vpop.xlane.xlu0 %727 }
 0x392   : > { %v732_v30 = vmax.f32 %v728_v29, 1e-20 }
 0x394   : > { %1331 = vrcp.f32 %v732_v30 }
 0x395   : > { %v774_v31 = vpop.xlane.xlu0 %773 }
 0x396   : > { %v778_v32 = vmax.f32 %v774_v31, 1e-20 }
 0x398   : > { %1333 = vrcp.f32 %v778_v32 }
 0x399   : > { %v731_v33 = vpop.xlane.xlu1 %730 }
 0x39a   : > { %v733_v34 = vmax.f32 %v731_v33, 1e-20 }
 0x39c   : > { %1335 = vrcp.f32 %v733_v34 }
 0x39d   : > { %v777_v35 = vpop.xlane.xlu0 %776 }
 0x39e   : > { %v1332_v36 = vpop.eup %1331  ;;  %v779_v37 = vmax.f32 %v777_v35, 1e-20 }
 0x39f   : > { %v736_v38 = vmul.f32 %v1332_v36, %v1324_v6 }
 0x3a0   : > { %1337 = vrcp.f32 %v779_v37 }
 0x3a1   : > { %1197 = vmatprep.mubr.msk.f32.mxu0 %vm713_vm6, %v736_v38 }
 0x3a2   : > { %v1334_v39 = vpop.eup %1333 }
 0x3a3   : > { %v782_v40 = vmul.f32 %v1334_v39, %v1326_v9 }
 0x3a5   : > { %1186 = vmatprep.mubr.msk.f32.mxu1 %vm713_vm6, %v782_v40 }
 0x3a6   : > { %v1336_v41 = vpop.eup %1335 }
 0x3a7   : > { %v737_v42 = vmul.f32 %v1336_v41, %v1328_v11 }
 0x3a9   : > { %1198 = vmatmul.mubr.msk.f32.vlgmr.msra.gmra.mrb[8].mxu0 %vm713_vm6, %v737_v42 }
 0x3aa   : > { %v1338_v43 = vpop.eup %1337 }
 0x3ab   : > { %v783_v44 = vmul.f32 %v1338_v43, %v1330_v13 }
 0x3ad   : > { %1187 = vmatmul.mubr.msk.f32.vlgmr.msra.gmra.mrb[8].mxu1 %vm713_vm6, %v783_v44 }
 0x47c   : > { %v1199_v45 = vpop.f32.mrb[8].mxu0 }
 0x47d   : > { %v937_v46 = vpop.f32.mrb[9].mxu0 }
 0x480   : > { %v1188_v47 = vpop.f32.mrb[8].mxu1 }
 0x481   : > { %v943_v48 = vadd.f32 %v1199_v45, %v1188_v47  ;;  %v856_v49 = vpop.f32.mrb[9].mxu1 }
 0x482   : > { %v938_v51 = vadd.f32 %v937_v46, %v856_v49 }
 0x483   : > { %v947_v52 = vmul.f32 0.5, %v943_v48 }
 0x484   : > { %v946_v53 = vmul.f32 0.5, %v938_v51 }
 0x485   : > { %v956_v54 = vadd.f32 %v1144_v50, %v947_v52 }
 0x486   : > { %v955_v55 = vadd.f32 %v1144_v50, %v946_v53 }
 0x487   : > { %v958_v56 = vadd.f32 %v956_v54, %v1924_v17 }
 0x488   : > { %v957_v57 = vadd.f32 %v955_v55, %v1922_v15 }
 0x489   : > { %960 = vst [vmem:[%s359_s27 + $0x8] sm:$0xff] %v958_v56 }
 0x48a   : > { %959 = vst [vmem:[%s359_s27] sm:$0xff] %v957_v57 }
 0x48b   : > { %1524 = shalt.err (!%p1521_p12)
}
 0x48c   : > { %s1525_s15 = scalar_lea.hbm %s1954_s12, 256  ;;  %s1529_s28 = scalar_lea.hbm %s2004_s6, 512 }
 0x48d   : > { %p1526_p13 = scmp.ne.s32.totalorder %s1954_s12, %s1525_s15  ;;  %p1530_p10 = scmp.lt.u32.totalorder %s1954_s12, %s2004_s6 }
 0x48e   : > { %p1531_p2 = scmp.lt.u32.totalorder %s1529_s28, %s1525_s15  ;;  %p1533_p6 = scmp.lt.u32.totalorder %s1525_s15, %s1954_s12 }
 0x48f   : > { %p1527_p7 = pnand %p1526_p13, %p2052_p3 }
 0x490   : > { %p1532_p4 = por %p1531_p2, %p1530_p10 }
 0x491   : > { %p1528_p5 = pneg %p1527_p7 }
 0x492   : > { %p1534_p0 = por %p1533_p6, %p1532_p4 }
 0x494   : > { %p1535_p8 = pnand %p1534_p0, %p1528_p5 }
 0x496   : > { %1538 = shalt.err (!%p1535_p8)
}
 0x497   : > { %s1605_s19 = smov 128   ;;  %s1606_s30 = smov 8  }
 0x498   : > { %1238 = dma.vmem_to_hbm [thread:$0]  (%p2052_p3), %s1947_s20, 256, %s1954_s12, %s962_s10, %s1605_s19, %s1605_s19, %s1606_s30  }
 0x499 PF: > { %s2053_s3 = sld [smem:[#allocation19_spill]]  ;;  %s2054_s29 = sld [smem:[#allocation21_spill]] }
 0x49a   : > { %p2056_p9 = scmp.ge.s32.totalorder %s1589_s24, 2 }
 0x49f   : > { %s990_s11 = sand.u32 1, %s2053_s3   ;;  %p2055_p11 = scmp.ne.s32.totalorder %s2054_s29, 0 }
 0x4a0   : > { %s991_s27 = scalar_lea.sflag [#allocation4], %s990_s11 }
 0x4a1   : > { %p1261_p1 = pnand %p2056_p9, %p2055_p11 }
 0x4a3   : > { %1572 = dma.done.wait (!%p1261_p1), %s991_s27, 256  }
 0x4a4   : > { %1574 = vsyncadd (!%p1261_p1), %s991_s27, 4294967040  ;;  %s2057_s24 = sld [smem:[#allocation22_spill]]  ;;  %s2058_s18 = sld [smem:[#allocation20_spill]] }
 0x4a5   : > { %s2059_s23 = sld [smem:[#allocation23_spill]]  ;;  %s2060_s21 = smov %s1581_s22 }
 0x4aa   : > { %p22_p12 = scmp.ge.s32.totalorder %s2057_s24, 4   ;;  %s2061_s22 = smov %s2058_s18 }
 0x4ac   :  { %24 = sbr.rel (!%p22_p12) target bundleno = 11 (0xb), region = 117 }
 0x4b3   :  { %996 = vsyncpa [#allocation3], 1 }
 0x4b4   :  { %998 = vsyncpa [#allocation3 + $0x1], 1 }
 0x4b5   :  { %999 = vsyncpa [#allocation6], 1 }
 0x4b6   :  { %1001 = vsyncpa [#allocation6 + $0x1], 1 }
 0x4b7   :  { %1002 = vsyncpa [#allocation9], 1 }
 0x4b8   :  { %1003 = vsyncpa [#allocation12], 1 }
 0x4b9   :  { %1004 = vsyncpa [#allocation4], 1 }
 0x4ba   :  { %1006 = vsyncpa [#allocation4 + $0x1], 1 }

</bundles_post_ra>
